<compile_context>
chip_gen: v5e
topology: v5e:2x2
jax: 0.10.0
libtpu: 0.0.40
codegen_flags: <defaults>
</compile_context>

<pallas_src>
import jax
import jax.numpy as jnp
from jax.experimental import pallas as pl
from jax.experimental.pallas import tpu as pltpu

DIN, DH, DOUT = 4, 10, 3
LANES = 128
SUBLANES = 8
MAX_ROW_BLOCK = 512  # rows of 128 lanes per grid step


def _round_up(a, b):
    return (a + b - 1) // b * b


def mlp_kernel(x_ref, w1_ref, b1_ref, w2_ref, b2_ref, o_ref):
    """VPU-only transposed MLP.

    x_ref : (DIN, RB, 128)  f32 VMEM   -- batch on sublane x lane axes
    w1/b1 : (DIN, DH), (DH,)   f32 SMEM scalars
    w2/b2 : (DH, DOUT), (DOUT,) f32 SMEM scalars
    o_ref : (DOUT, RB, 128) f32 VMEM
    """
    # Hoist the DIN dense input tiles once (static indices -> plain vld).
    x = [x_ref[k] for k in range(DIN)]

    # Layer 1: h[o] = relu(sum_k w1[k,o] * x[k] + b1[o])
    # Fully unrolled scalar-broadcast MACs on dense (RB, 128) tiles.
    h = []
    for o in range(DH):
        acc = x[0] * w1_ref[0, o]
        for k in range(1, DIN):
            acc = acc + x[k] * w1_ref[k, o]
        h.append(jnp.maximum(acc + b1_ref[o], 0.0))

    # Layer 2: y[j] = sum_o w2[o,j] * h[o] + b2[j]  -> lane-dense stores.
    for j in range(DOUT):
        y = h[0] * w2_ref[0, j]
        for o in range(1, DH):
            y = y + h[o] * w2_ref[o, j]
        o_ref[j] = (y + b2_ref[j]).astype(o_ref.dtype)


@jax.jit
def mlp_forward(x, w1, b1, w2, b2):
    B, din = x.shape
    assert din == DIN

    # ---- lane-dense layout plumbing (pure XLA, outside the kernel) --------
    # Pad the batch so it fills whole (8,128) vregs and divides the row block.
    rows = _round_up(B, SUBLANES * LANES) // LANES
    rb = min(MAX_ROW_BLOCK, rows)
    rows = _round_up(rows, rb)
    b_pad = rows * LANES

    xp = jnp.pad(x, ((0, b_pad - B), (0, 0)))       # (B_pad, DIN)
    x3 = xp.T.reshape(DIN, rows, LANES)             # (DIN, rows, 128)

    out3 = pl.pallas_call(
        mlp_kernel,
        out_shape=jax.ShapeDtypeStruct((DOUT, rows, LANES), x.dtype),
        grid=(rows // rb,),
        in_specs=[
            pl.BlockSpec((DIN, rb, LANES), lambda g: (0, g, 0)),
            pl.BlockSpec(memory_space=pltpu.MemorySpace.SMEM),  # w1
            pl.BlockSpec(memory_space=pltpu.MemorySpace.SMEM),  # b1
            pl.BlockSpec(memory_space=pltpu.MemorySpace.SMEM),  # w2
            pl.BlockSpec(memory_space=pltpu.MemorySpace.SMEM),  # b2
        ],
        out_specs=pl.BlockSpec((DOUT, rb, LANES), lambda g: (0, g, 0)),
        compiler_params=pltpu.CompilerParams(
            dimension_semantics=("parallel",)),
    )(x3, w1, b1, w2, b2)

    # Back to PyTorch layout (B, DOUT).
    return out3.reshape(DOUT, b_pad)[:, :B].T


def init_params(key):
    # Mimic PyTorch nn.Linear default init: U(-1/sqrt(fan_in), 1/sqrt(fan_in)).
    k1, k2, k3, k4 = jax.random.split(key, 4)
    bound1 = 1.0 / jnp.sqrt(float(DIN))
    bound2 = 1.0 / jnp.sqrt(float(DH))
    # Stored as (in_features, out_features); biases as flat vectors.
    w1 = jax.random.uniform(k1, (DIN, DH), jnp.float32, -bound1, bound1)
    b1 = jax.random.uniform(k2, (DH,), jnp.float32, -bound1, bound1)
    w2 = jax.random.uniform(k3, (DH, DOUT), jnp.float32, -bound2, bound2)
    b2 = jax.random.uniform(k4, (DOUT,), jnp.float32, -bound2, bound2)
    return w1, b1, w2, b2


if __name__ == "__main__":
    key = jax.random.PRNGKey(0)
    kx, kp = jax.random.split(key)
    w1, b1, w2, b2 = init_params(kp)

    # Small deterministic checks (also exercises the batch-padding path).
    for B in (8, 200):
        x = jax.random.normal(jax.random.fold_in(kx, B), (B, DIN), jnp.float32)
        y = mlp_forward(x, w1, b1, w2, b2)
        jax.block_until_ready(y)

        ref = jnp.maximum(x @ w1 + b1, 0.0) @ w2 + b2
        assert y.shape == (B, DOUT)
        assert jnp.allclose(y, ref, atol=1e-5, rtol=1e-5)

    print("KERNEL_OK")
</pallas_src>

<mosaic_0001>
module attributes {stable_mosaic.version = 11 : i64} {
  func.func @mlp_kernel(%arg0: i32, %arg1: memref<4x8x128xf32, #tpu.memory_space<vmem>>, %arg2: memref<4x10xf32, #tpu.memory_space<smem>>, %arg3: memref<10xf32, #tpu.memory_space<smem>>, %arg4: memref<10x3xf32, #tpu.memory_space<smem>>, %arg5: memref<3xf32, #tpu.memory_space<smem>>, %arg6: memref<3x8x128xf32, #tpu.memory_space<vmem>>) attributes {dimension_semantics = [#tpu.dimension_semantics<parallel>], iteration_bounds = array<i64: 1>, scalar_prefetch = 0 : i64, scratch_operands = 0 : i64, tpu.core_type = #tpu.core_type<tc>, window_params = [{transform_indices = @transform_0, window_bounds = array<i64: 4, 8, 128>}, {transform_indices = @transform_1, window_bounds = array<i64: 4, 10>}, {transform_indices = @transform_2, window_bounds = array<i64: 10>}, {transform_indices = @transform_3, window_bounds = array<i64: 10, 3>}, {transform_indices = @transform_4, window_bounds = array<i64: 3>}, {transform_indices = @transform_5, window_bounds = array<i64: 3, 8, 128>}]} {
    %c0 = arith.constant 0 : index
    %c0_0 = arith.constant 0 : index
    %c0_1 = arith.constant 0 : index
    %0 = vector.load %arg1[%c0, %c0_0, %c0_1] : memref<4x8x128xf32, #tpu.memory_space<vmem>>, vector<1x8x128xf32>
    %1 = vector.shape_cast %0 : vector<1x8x128xf32> to vector<8x128xf32>
    %c1 = arith.constant 1 : index
    %c0_2 = arith.constant 0 : index
    %c0_3 = arith.constant 0 : index
    %2 = vector.load %arg1[%c1, %c0_2, %c0_3] : memref<4x8x128xf32, #tpu.memory_space<vmem>>, vector<1x8x128xf32>
    %3 = vector.shape_cast %2 : vector<1x8x128xf32> to vector<8x128xf32>
    %c2 = arith.constant 2 : index
    %c0_4 = arith.constant 0 : index
    %c0_5 = arith.constant 0 : index
    %4 = vector.load %arg1[%c2, %c0_4, %c0_5] : memref<4x8x128xf32, #tpu.memory_space<vmem>>, vector<1x8x128xf32>
    %5 = vector.shape_cast %4 : vector<1x8x128xf32> to vector<8x128xf32>
    %c3 = arith.constant 3 : index
    %c0_6 = arith.constant 0 : index
    %c0_7 = arith.constant 0 : index
    %6 = vector.load %arg1[%c3, %c0_6, %c0_7] : memref<4x8x128xf32, #tpu.memory_space<vmem>>, vector<1x8x128xf32>
    %7 = vector.shape_cast %6 : vector<1x8x128xf32> to vector<8x128xf32>
    %c0_8 = arith.constant 0 : index
    %c0_9 = arith.constant 0 : index
    %8 = memref.load %arg2[%c0_8, %c0_9] : memref<4x10xf32, #tpu.memory_space<smem>>
    %9 = vector.broadcast %8 : f32 to vector<8x128xf32>
    %10 = arith.mulf %1, %9 : vector<8x128xf32>
    %c1_10 = arith.constant 1 : index
    %c0_11 = arith.constant 0 : index
    %11 = memref.load %arg2[%c1_10, %c0_11] : memref<4x10xf32, #tpu.memory_space<smem>>
    %12 = vector.broadcast %11 : f32 to vector<8x128xf32>
    %13 = arith.mulf %3, %12 : vector<8x128xf32>
    %14 = arith.addf %10, %13 : vector<8x128xf32>
    %c2_12 = arith.constant 2 : index
    %c0_13 = arith.constant 0 : index
    %15 = memref.load %arg2[%c2_12, %c0_13] : memref<4x10xf32, #tpu.memory_space<smem>>
    %16 = vector.broadcast %15 : f32 to vector<8x128xf32>
    %17 = arith.mulf %5, %16 : vector<8x128xf32>
    %18 = arith.addf %14, %17 : vector<8x128xf32>
    %c3_14 = arith.constant 3 : index
    %c0_15 = arith.constant 0 : index
    %19 = memref.load %arg2[%c3_14, %c0_15] : memref<4x10xf32, #tpu.memory_space<smem>>
    %20 = vector.broadcast %19 : f32 to vector<8x128xf32>
    %21 = arith.mulf %7, %20 : vector<8x128xf32>
    %22 = arith.addf %18, %21 : vector<8x128xf32>
    %c0_16 = arith.constant 0 : index
    %23 = memref.load %arg3[%c0_16] : memref<10xf32, #tpu.memory_space<smem>>
    %24 = vector.broadcast %23 : f32 to vector<8x128xf32>
    %25 = arith.addf %22, %24 : vector<8x128xf32>
    %cst = arith.constant 0.000000e+00 : f32
    %26 = vector.broadcast %cst : f32 to vector<8x128xf32>
    %27 = arith.maximumf %25, %26 : vector<8x128xf32>
    %c0_17 = arith.constant 0 : index
    %c1_18 = arith.constant 1 : index
    %28 = memref.load %arg2[%c0_17, %c1_18] : memref<4x10xf32, #tpu.memory_space<smem>>
    %29 = vector.broadcast %28 : f32 to vector<8x128xf32>
    %30 = arith.mulf %1, %29 : vector<8x128xf32>
    %c1_19 = arith.constant 1 : index
    %c1_20 = arith.constant 1 : index
    %31 = memref.load %arg2[%c1_19, %c1_20] : memref<4x10xf32, #tpu.memory_space<smem>>
    %32 = vector.broadcast %31 : f32 to vector<8x128xf32>
    %33 = arith.mulf %3, %32 : vector<8x128xf32>
    %34 = arith.addf %30, %33 : vector<8x128xf32>
    %c2_21 = arith.constant 2 : index
    %c1_22 = arith.constant 1 : index
    %35 = memref.load %arg2[%c2_21, %c1_22] : memref<4x10xf32, #tpu.memory_space<smem>>
    %36 = vector.broadcast %35 : f32 to vector<8x128xf32>
    %37 = arith.mulf %5, %36 : vector<8x128xf32>
    %38 = arith.addf %34, %37 : vector<8x128xf32>
    %c3_23 = arith.constant 3 : index
    %c1_24 = arith.constant 1 : index
    %39 = memref.load %arg2[%c3_23, %c1_24] : memref<4x10xf32, #tpu.memory_space<smem>>
    %40 = vector.broadcast %39 : f32 to vector<8x128xf32>
    %41 = arith.mulf %7, %40 : vector<8x128xf32>
    %42 = arith.addf %38, %41 : vector<8x128xf32>
    %c1_25 = arith.constant 1 : index
    %43 = memref.load %arg3[%c1_25] : memref<10xf32, #tpu.memory_space<smem>>
    %44 = vector.broadcast %43 : f32 to vector<8x128xf32>
    %45 = arith.addf %42, %44 : vector<8x128xf32>
    %cst_26 = arith.constant 0.000000e+00 : f32
    %46 = vector.broadcast %cst_26 : f32 to vector<8x128xf32>
    %47 = arith.maximumf %45, %46 : vector<8x128xf32>
    %c0_27 = arith.constant 0 : index
    %c2_28 = arith.constant 2 : index
    %48 = memref.load %arg2[%c0_27, %c2_28] : memref<4x10xf32, #tpu.memory_space<smem>>
    %49 = vector.broadcast %48 : f32 to vector<8x128xf32>
    %50 = arith.mulf %1, %49 : vector<8x128xf32>
    %c1_29 = arith.constant 1 : index
    %c2_30 = arith.constant 2 : index
    %51 = memref.load %arg2[%c1_29, %c2_30] : memref<4x10xf32, #tpu.memory_space<smem>>
    %52 = vector.broadcast %51 : f32 to vector<8x128xf32>
    %53 = arith.mulf %3, %52 : vector<8x128xf32>
    %54 = arith.addf %50, %53 : vector<8x128xf32>
    %c2_31 = arith.constant 2 : index
    %c2_32 = arith.constant 2 : index
    %55 = memref.load %arg2[%c2_31, %c2_32] : memref<4x10xf32, #tpu.memory_space<smem>>
    %56 = vector.broadcast %55 : f32 to vector<8x128xf32>
    %57 = arith.mulf %5, %56 : vector<8x128xf32>
    %58 = arith.addf %54, %57 : vector<8x128xf32>
    %c3_33 = arith.constant 3 : index
    %c2_34 = arith.constant 2 : index
    %59 = memref.load %arg2[%c3_33, %c2_34] : memref<4x10xf32, #tpu.memory_space<smem>>
    %60 = vector.broadcast %59 : f32 to vector<8x128xf32>
    %61 = arith.mulf %7, %60 : vector<8x128xf32>
    %62 = arith.addf %58, %61 : vector<8x128xf32>
    %c2_35 = arith.constant 2 : index
    %63 = memref.load %arg3[%c2_35] : memref<10xf32, #tpu.memory_space<smem>>
    %64 = vector.broadcast %63 : f32 to vector<8x128xf32>
    %65 = arith.addf %62, %64 : vector<8x128xf32>
    %cst_36 = arith.constant 0.000000e+00 : f32
    %66 = vector.broadcast %cst_36 : f32 to vector<8x128xf32>
    %67 = arith.maximumf %65, %66 : vector<8x128xf32>
    %c0_37 = arith.constant 0 : index
    %c3_38 = arith.constant 3 : index
    %68 = memref.load %arg2[%c0_37, %c3_38] : memref<4x10xf32, #tpu.memory_space<smem>>
    %69 = vector.broadcast %68 : f32 to vector<8x128xf32>
    %70 = arith.mulf %1, %69 : vector<8x128xf32>
    %c1_39 = arith.constant 1 : index
    %c3_40 = arith.constant 3 : index
    %71 = memref.load %arg2[%c1_39, %c3_40] : memref<4x10xf32, #tpu.memory_space<smem>>
    %72 = vector.broadcast %71 : f32 to vector<8x128xf32>
    %73 = arith.mulf %3, %72 : vector<8x128xf32>
    %74 = arith.addf %70, %73 : vector<8x128xf32>
    %c2_41 = arith.constant 2 : index
    %c3_42 = arith.constant 3 : index
    %75 = memref.load %arg2[%c2_41, %c3_42] : memref<4x10xf32, #tpu.memory_space<smem>>
    %76 = vector.broadcast %75 : f32 to vector<8x128xf32>
    %77 = arith.mulf %5, %76 : vector<8x128xf32>
    %78 = arith.addf %74, %77 : vector<8x128xf32>
    %c3_43 = arith.constant 3 : index
    %c3_44 = arith.constant 3 : index
    %79 = memref.load %arg2[%c3_43, %c3_44] : memref<4x10xf32, #tpu.memory_space<smem>>
    %80 = vector.broadcast %79 : f32 to vector<8x128xf32>
    %81 = arith.mulf %7, %80 : vector<8x128xf32>
    %82 = arith.addf %78, %81 : vector<8x128xf32>
    %c3_45 = arith.constant 3 : index
    %83 = memref.load %arg3[%c3_45] : memref<10xf32, #tpu.memory_space<smem>>
    %84 = vector.broadcast %83 : f32 to vector<8x128xf32>
    %85 = arith.addf %82, %84 : vector<8x128xf32>
    %cst_46 = arith.constant 0.000000e+00 : f32
    %86 = vector.broadcast %cst_46 : f32 to vector<8x128xf32>
    %87 = arith.maximumf %85, %86 : vector<8x128xf32>
    %c0_47 = arith.constant 0 : index
    %c4 = arith.constant 4 : index
    %88 = memref.load %arg2[%c0_47, %c4] : memref<4x10xf32, #tpu.memory_space<smem>>
    %89 = vector.broadcast %88 : f32 to vector<8x128xf32>
    %90 = arith.mulf %1, %89 : vector<8x128xf32>
    %c1_48 = arith.constant 1 : index
    %c4_49 = arith.constant 4 : index
    %91 = memref.load %arg2[%c1_48, %c4_49] : memref<4x10xf32, #tpu.memory_space<smem>>
    %92 = vector.broadcast %91 : f32 to vector<8x128xf32>
    %93 = arith.mulf %3, %92 : vector<8x128xf32>
    %94 = arith.addf %90, %93 : vector<8x128xf32>
    %c2_50 = arith.constant 2 : index
    %c4_51 = arith.constant 4 : index
    %95 = memref.load %arg2[%c2_50, %c4_51] : memref<4x10xf32, #tpu.memory_space<smem>>
    %96 = vector.broadcast %95 : f32 to vector<8x128xf32>
    %97 = arith.mulf %5, %96 : vector<8x128xf32>
    %98 = arith.addf %94, %97 : vector<8x128xf32>
    %c3_52 = arith.constant 3 : index
    %c4_53 = arith.constant 4 : index
    %99 = memref.load %arg2[%c3_52, %c4_53] : memref<4x10xf32, #tpu.memory_space<smem>>
    %100 = vector.broadcast %99 : f32 to vector<8x128xf32>
    %101 = arith.mulf %7, %100 : vector<8x128xf32>
    %102 = arith.addf %98, %101 : vector<8x128xf32>
    %c4_54 = arith.constant 4 : index
    %103 = memref.load %arg3[%c4_54] : memref<10xf32, #tpu.memory_space<smem>>
    %104 = vector.broadcast %103 : f32 to vector<8x128xf32>
    %105 = arith.addf %102, %104 : vector<8x128xf32>
    %cst_55 = arith.constant 0.000000e+00 : f32
    %106 = vector.broadcast %cst_55 : f32 to vector<8x128xf32>
    %107 = arith.maximumf %105, %106 : vector<8x128xf32>
    %c0_56 = arith.constant 0 : index
    %c5 = arith.constant 5 : index
    %108 = memref.load %arg2[%c0_56, %c5] : memref<4x10xf32, #tpu.memory_space<smem>>
    %109 = vector.broadcast %108 : f32 to vector<8x128xf32>
    %110 = arith.mulf %1, %109 : vector<8x128xf32>
    %c1_57 = arith.constant 1 : index
    %c5_58 = arith.constant 5 : index
    %111 = memref.load %arg2[%c1_57, %c5_58] : memref<4x10xf32, #tpu.memory_space<smem>>
    %112 = vector.broadcast %111 : f32 to vector<8x128xf32>
    %113 = arith.mulf %3, %112 : vector<8x128xf32>
    %114 = arith.addf %110, %113 : vector<8x128xf32>
    %c2_59 = arith.constant 2 : index
    %c5_60 = arith.constant 5 : index
    %115 = memref.load %arg2[%c2_59, %c5_60] : memref<4x10xf32, #tpu.memory_space<smem>>
    %116 = vector.broadcast %115 : f32 to vector<8x128xf32>
    %117 = arith.mulf %5, %116 : vector<8x128xf32>
    %118 = arith.addf %114, %117 : vector<8x128xf32>
    %c3_61 = arith.constant 3 : index
    %c5_62 = arith.constant 5 : index
    %119 = memref.load %arg2[%c3_61, %c5_62] : memref<4x10xf32, #tpu.memory_space<smem>>
    %120 = vector.broadcast %119 : f32 to vector<8x128xf32>
    %121 = arith.mulf %7, %120 : vector<8x128xf32>
    %122 = arith.addf %118, %121 : vector<8x128xf32>
    %c5_63 = arith.constant 5 : index
    %123 = memref.load %arg3[%c5_63] : memref<10xf32, #tpu.memory_space<smem>>
    %124 = vector.broadcast %123 : f32 to vector<8x128xf32>
    %125 = arith.addf %122, %124 : vector<8x128xf32>
    %cst_64 = arith.constant 0.000000e+00 : f32
    %126 = vector.broadcast %cst_64 : f32 to vector<8x128xf32>
    %127 = arith.maximumf %125, %126 : vector<8x128xf32>
    %c0_65 = arith.constant 0 : index
    %c6 = arith.constant 6 : index
    %128 = memref.load %arg2[%c0_65, %c6] : memref<4x10xf32, #tpu.memory_space<smem>>
    %129 = vector.broadcast %128 : f32 to vector<8x128xf32>
    %130 = arith.mulf %1, %129 : vector<8x128xf32>
    %c1_66 = arith.constant 1 : index
    %c6_67 = arith.constant 6 : index
    %131 = memref.load %arg2[%c1_66, %c6_67] : memref<4x10xf32, #tpu.memory_space<smem>>
    %132 = vector.broadcast %131 : f32 to vector<8x128xf32>
    %133 = arith.mulf %3, %132 : vector<8x128xf32>
    %134 = arith.addf %130, %133 : vector<8x128xf32>
    %c2_68 = arith.constant 2 : index
    %c6_69 = arith.constant 6 : index
    %135 = memref.load %arg2[%c2_68, %c6_69] : memref<4x10xf32, #tpu.memory_space<smem>>
    %136 = vector.broadcast %135 : f32 to vector<8x128xf32>
    %137 = arith.mulf %5, %136 : vector<8x128xf32>
    %138 = arith.addf %134, %137 : vector<8x128xf32>
    %c3_70 = arith.constant 3 : index
    %c6_71 = arith.constant 6 : index
    %139 = memref.load %arg2[%c3_70, %c6_71] : memref<4x10xf32, #tpu.memory_space<smem>>
    %140 = vector.broadcast %139 : f32 to vector<8x128xf32>
    %141 = arith.mulf %7, %140 : vector<8x128xf32>
    %142 = arith.addf %138, %141 : vector<8x128xf32>
    %c6_72 = arith.constant 6 : index
    %143 = memref.load %arg3[%c6_72] : memref<10xf32, #tpu.memory_space<smem>>
    %144 = vector.broadcast %143 : f32 to vector<8x128xf32>
    %145 = arith.addf %142, %144 : vector<8x128xf32>
    %cst_73 = arith.constant 0.000000e+00 : f32
    %146 = vector.broadcast %cst_73 : f32 to vector<8x128xf32>
    %147 = arith.maximumf %145, %146 : vector<8x128xf32>
    %c0_74 = arith.constant 0 : index
    %c7 = arith.constant 7 : index
    %148 = memref.load %arg2[%c0_74, %c7] : memref<4x10xf32, #tpu.memory_space<smem>>
    %149 = vector.broadcast %148 : f32 to vector<8x128xf32>
    %150 = arith.mulf %1, %149 : vector<8x128xf32>
    %c1_75 = arith.constant 1 : index
    %c7_76 = arith.constant 7 : index
    %151 = memref.load %arg2[%c1_75, %c7_76] : memref<4x10xf32, #tpu.memory_space<smem>>
    %152 = vector.broadcast %151 : f32 to vector<8x128xf32>
    %153 = arith.mulf %3, %152 : vector<8x128xf32>
    %154 = arith.addf %150, %153 : vector<8x128xf32>
    %c2_77 = arith.constant 2 : index
    %c7_78 = arith.constant 7 : index
    %155 = memref.load %arg2[%c2_77, %c7_78] : memref<4x10xf32, #tpu.memory_space<smem>>
    %156 = vector.broadcast %155 : f32 to vector<8x128xf32>
    %157 = arith.mulf %5, %156 : vector<8x128xf32>
    %158 = arith.addf %154, %157 : vector<8x128xf32>
    %c3_79 = arith.constant 3 : index
    %c7_80 = arith.constant 7 : index
    %159 = memref.load %arg2[%c3_79, %c7_80] : memref<4x10xf32, #tpu.memory_space<smem>>
    %160 = vector.broadcast %159 : f32 to vector<8x128xf32>
    %161 = arith.mulf %7, %160 : vector<8x128xf32>
    %162 = arith.addf %158, %161 : vector<8x128xf32>
    %c7_81 = arith.constant 7 : index
    %163 = memref.load %arg3[%c7_81] : memref<10xf32, #tpu.memory_space<smem>>
    %164 = vector.broadcast %163 : f32 to vector<8x128xf32>
    %165 = arith.addf %162, %164 : vector<8x128xf32>
    %cst_82 = arith.constant 0.000000e+00 : f32
    %166 = vector.broadcast %cst_82 : f32 to vector<8x128xf32>
    %167 = arith.maximumf %165, %166 : vector<8x128xf32>
    %c0_83 = arith.constant 0 : index
    %c8 = arith.constant 8 : index
    %168 = memref.load %arg2[%c0_83, %c8] : memref<4x10xf32, #tpu.memory_space<smem>>
    %169 = vector.broadcast %168 : f32 to vector<8x128xf32>
    %170 = arith.mulf %1, %169 : vector<8x128xf32>
    %c1_84 = arith.constant 1 : index
    %c8_85 = arith.constant 8 : index
    %171 = memref.load %arg2[%c1_84, %c8_85] : memref<4x10xf32, #tpu.memory_space<smem>>
    %172 = vector.broadcast %171 : f32 to vector<8x128xf32>
    %173 = arith.mulf %3, %172 : vector<8x128xf32>
    %174 = arith.addf %170, %173 : vector<8x128xf32>
    %c2_86 = arith.constant 2 : index
    %c8_87 = arith.constant 8 : index
    %175 = memref.load %arg2[%c2_86, %c8_87] : memref<4x10xf32, #tpu.memory_space<smem>>
    %176 = vector.broadcast %175 : f32 to vector<8x128xf32>
    %177 = arith.mulf %5, %176 : vector<8x128xf32>
    %178 = arith.addf %174, %177 : vector<8x128xf32>
    %c3_88 = arith.constant 3 : index
    %c8_89 = arith.constant 8 : index
    %179 = memref.load %arg2[%c3_88, %c8_89] : memref<4x10xf32, #tpu.memory_space<smem>>
    %180 = vector.broadcast %179 : f32 to vector<8x128xf32>
    %181 = arith.mulf %7, %180 : vector<8x128xf32>
    %182 = arith.addf %178, %181 : vector<8x128xf32>
    %c8_90 = arith.constant 8 : index
    %183 = memref.load %arg3[%c8_90] : memref<10xf32, #tpu.memory_space<smem>>
    %184 = vector.broadcast %183 : f32 to vector<8x128xf32>
    %185 = arith.addf %182, %184 : vector<8x128xf32>
    %cst_91 = arith.constant 0.000000e+00 : f32
    %186 = vector.broadcast %cst_91 : f32 to vector<8x128xf32>
    %187 = arith.maximumf %185, %186 : vector<8x128xf32>
    %c0_92 = arith.constant 0 : index
    %c9 = arith.constant 9 : index
    %188 = memref.load %arg2[%c0_92, %c9] : memref<4x10xf32, #tpu.memory_space<smem>>
    %189 = vector.broadcast %188 : f32 to vector<8x128xf32>
    %190 = arith.mulf %1, %189 : vector<8x128xf32>
    %c1_93 = arith.constant 1 : index
    %c9_94 = arith.constant 9 : index
    %191 = memref.load %arg2[%c1_93, %c9_94] : memref<4x10xf32, #tpu.memory_space<smem>>
    %192 = vector.broadcast %191 : f32 to vector<8x128xf32>
    %193 = arith.mulf %3, %192 : vector<8x128xf32>
    %194 = arith.addf %190, %193 : vector<8x128xf32>
    %c2_95 = arith.constant 2 : index
    %c9_96 = arith.constant 9 : index
    %195 = memref.load %arg2[%c2_95, %c9_96] : memref<4x10xf32, #tpu.memory_space<smem>>
    %196 = vector.broadcast %195 : f32 to vector<8x128xf32>
    %197 = arith.mulf %5, %196 : vector<8x128xf32>
    %198 = arith.addf %194, %197 : vector<8x128xf32>
    %c3_97 = arith.constant 3 : index
    %c9_98 = arith.constant 9 : index
    %199 = memref.load %arg2[%c3_97, %c9_98] : memref<4x10xf32, #tpu.memory_space<smem>>
    %200 = vector.broadcast %199 : f32 to vector<8x128xf32>
    %201 = arith.mulf %7, %200 : vector<8x128xf32>
    %202 = arith.addf %198, %201 : vector<8x128xf32>
    %c9_99 = arith.constant 9 : index
    %203 = memref.load %arg3[%c9_99] : memref<10xf32, #tpu.memory_space<smem>>
    %204 = vector.broadcast %203 : f32 to vector<8x128xf32>
    %205 = arith.addf %202, %204 : vector<8x128xf32>
    %cst_100 = arith.constant 0.000000e+00 : f32
    %206 = vector.broadcast %cst_100 : f32 to vector<8x128xf32>
    %207 = arith.maximumf %205, %206 : vector<8x128xf32>
    %c0_101 = arith.constant 0 : index
    %c0_102 = arith.constant 0 : index
    %208 = memref.load %arg4[%c0_101, %c0_102] : memref<10x3xf32, #tpu.memory_space<smem>>
    %209 = vector.broadcast %208 : f32 to vector<8x128xf32>
    %210 = arith.mulf %27, %209 : vector<8x128xf32>
    %c1_103 = arith.constant 1 : index
    %c0_104 = arith.constant 0 : index
    %211 = memref.load %arg4[%c1_103, %c0_104] : memref<10x3xf32, #tpu.memory_space<smem>>
    %212 = vector.broadcast %211 : f32 to vector<8x128xf32>
    %213 = arith.mulf %47, %212 : vector<8x128xf32>
    %214 = arith.addf %210, %213 : vector<8x128xf32>
    %c2_105 = arith.constant 2 : index
    %c0_106 = arith.constant 0 : index
    %215 = memref.load %arg4[%c2_105, %c0_106] : memref<10x3xf32, #tpu.memory_space<smem>>
    %216 = vector.broadcast %215 : f32 to vector<8x128xf32>
    %217 = arith.mulf %67, %216 : vector<8x128xf32>
    %218 = arith.addf %214, %217 : vector<8x128xf32>
    %c3_107 = arith.constant 3 : index
    %c0_108 = arith.constant 0 : index
    %219 = memref.load %arg4[%c3_107, %c0_108] : memref<10x3xf32, #tpu.memory_space<smem>>
    %220 = vector.broadcast %219 : f32 to vector<8x128xf32>
    %221 = arith.mulf %87, %220 : vector<8x128xf32>
    %222 = arith.addf %218, %221 : vector<8x128xf32>
    %c4_109 = arith.constant 4 : index
    %c0_110 = arith.constant 0 : index
    %223 = memref.load %arg4[%c4_109, %c0_110] : memref<10x3xf32, #tpu.memory_space<smem>>
    %224 = vector.broadcast %223 : f32 to vector<8x128xf32>
    %225 = arith.mulf %107, %224 : vector<8x128xf32>
    %226 = arith.addf %222, %225 : vector<8x128xf32>
    %c5_111 = arith.constant 5 : index
    %c0_112 = arith.constant 0 : index
    %227 = memref.load %arg4[%c5_111, %c0_112] : memref<10x3xf32, #tpu.memory_space<smem>>
    %228 = vector.broadcast %227 : f32 to vector<8x128xf32>
    %229 = arith.mulf %127, %228 : vector<8x128xf32>
    %230 = arith.addf %226, %229 : vector<8x128xf32>
    %c6_113 = arith.constant 6 : index
    %c0_114 = arith.constant 0 : index
    %231 = memref.load %arg4[%c6_113, %c0_114] : memref<10x3xf32, #tpu.memory_space<smem>>
    %232 = vector.broadcast %231 : f32 to vector<8x128xf32>
    %233 = arith.mulf %147, %232 : vector<8x128xf32>
    %234 = arith.addf %230, %233 : vector<8x128xf32>
    %c7_115 = arith.constant 7 : index
    %c0_116 = arith.constant 0 : index
    %235 = memref.load %arg4[%c7_115, %c0_116] : memref<10x3xf32, #tpu.memory_space<smem>>
    %236 = vector.broadcast %235 : f32 to vector<8x128xf32>
    %237 = arith.mulf %167, %236 : vector<8x128xf32>
    %238 = arith.addf %234, %237 : vector<8x128xf32>
    %c8_117 = arith.constant 8 : index
    %c0_118 = arith.constant 0 : index
    %239 = memref.load %arg4[%c8_117, %c0_118] : memref<10x3xf32, #tpu.memory_space<smem>>
    %240 = vector.broadcast %239 : f32 to vector<8x128xf32>
    %241 = arith.mulf %187, %240 : vector<8x128xf32>
    %242 = arith.addf %238, %241 : vector<8x128xf32>
    %c9_119 = arith.constant 9 : index
    %c0_120 = arith.constant 0 : index
    %243 = memref.load %arg4[%c9_119, %c0_120] : memref<10x3xf32, #tpu.memory_space<smem>>
    %244 = vector.broadcast %243 : f32 to vector<8x128xf32>
    %245 = arith.mulf %207, %244 : vector<8x128xf32>
    %246 = arith.addf %242, %245 : vector<8x128xf32>
    %c0_121 = arith.constant 0 : index
    %247 = memref.load %arg5[%c0_121] : memref<3xf32, #tpu.memory_space<smem>>
    %248 = vector.broadcast %247 : f32 to vector<8x128xf32>
    %249 = arith.addf %246, %248 : vector<8x128xf32>
    %c0_122 = arith.constant 0 : index
    %c0_123 = arith.constant 0 : index
    %c0_124 = arith.constant 0 : index
    %250 = vector.load %arg6[%c0_122, %c0_123, %c0_124] : memref<3x8x128xf32, #tpu.memory_space<vmem>>, vector<1x8x128xf32>
    %251 = vector.shape_cast %250 : vector<1x8x128xf32> to vector<8x128xf32>
    %252 = vector.shape_cast %249 : vector<8x128xf32> to vector<1x8x128xf32>
    tpu.vector_store %arg6[%c0_122, %c0_123, %c0_124], %252 {strides = array<i32>} : memref<3x8x128xf32, #tpu.memory_space<vmem>>, vector<1x8x128xf32>,
    %c0_125 = arith.constant 0 : index
    %c1_126 = arith.constant 1 : index
    %253 = memref.load %arg4[%c0_125, %c1_126] : memref<10x3xf32, #tpu.memory_space<smem>>
    %254 = vector.broadcast %253 : f32 to vector<8x128xf32>
    %255 = arith.mulf %27, %254 : vector<8x128xf32>
    %c1_127 = arith.constant 1 : index
    %c1_128 = arith.constant 1 : index
    %256 = memref.load %arg4[%c1_127, %c1_128] : memref<10x3xf32, #tpu.memory_space<smem>>
    %257 = vector.broadcast %256 : f32 to vector<8x128xf32>
    %258 = arith.mulf %47, %257 : vector<8x128xf32>
    %259 = arith.addf %255, %258 : vector<8x128xf32>
    %c2_129 = arith.constant 2 : index
    %c1_130 = arith.constant 1 : index
    %260 = memref.load %arg4[%c2_129, %c1_130] : memref<10x3xf32, #tpu.memory_space<smem>>
    %261 = vector.broadcast %260 : f32 to vector<8x128xf32>
    %262 = arith.mulf %67, %261 : vector<8x128xf32>
    %263 = arith.addf %259, %262 : vector<8x128xf32>
    %c3_131 = arith.constant 3 : index
    %c1_132 = arith.constant 1 : index
    %264 = memref.load %arg4[%c3_131, %c1_132] : memref<10x3xf32, #tpu.memory_space<smem>>
    %265 = vector.broadcast %264 : f32 to vector<8x128xf32>
    %266 = arith.mulf %87, %265 : vector<8x128xf32>
    %267 = arith.addf %263, %266 : vector<8x128xf32>
    %c4_133 = arith.constant 4 : index
    %c1_134 = arith.constant 1 : index
    %268 = memref.load %arg4[%c4_133, %c1_134] : memref<10x3xf32, #tpu.memory_space<smem>>
    %269 = vector.broadcast %268 : f32 to vector<8x128xf32>
    %270 = arith.mulf %107, %269 : vector<8x128xf32>
    %271 = arith.addf %267, %270 : vector<8x128xf32>
    %c5_135 = arith.constant 5 : index
    %c1_136 = arith.constant 1 : index
    %272 = memref.load %arg4[%c5_135, %c1_136] : memref<10x3xf32, #tpu.memory_space<smem>>
    %273 = vector.broadcast %272 : f32 to vector<8x128xf32>
    %274 = arith.mulf %127, %273 : vector<8x128xf32>
    %275 = arith.addf %271, %274 : vector<8x128xf32>
    %c6_137 = arith.constant 6 : index
    %c1_138 = arith.constant 1 : index
    %276 = memref.load %arg4[%c6_137, %c1_138] : memref<10x3xf32, #tpu.memory_space<smem>>
    %277 = vector.broadcast %276 : f32 to vector<8x128xf32>
    %278 = arith.mulf %147, %277 : vector<8x128xf32>
    %279 = arith.addf %275, %278 : vector<8x128xf32>
    %c7_139 = arith.constant 7 : index
    %c1_140 = arith.constant 1 : index
    %280 = memref.load %arg4[%c7_139, %c1_140] : memref<10x3xf32, #tpu.memory_space<smem>>
    %281 = vector.broadcast %280 : f32 to vector<8x128xf32>
    %282 = arith.mulf %167, %281 : vector<8x128xf32>
    %283 = arith.addf %279, %282 : vector<8x128xf32>
    %c8_141 = arith.constant 8 : index
    %c1_142 = arith.constant 1 : index
    %284 = memref.load %arg4[%c8_141, %c1_142] : memref<10x3xf32, #tpu.memory_space<smem>>
    %285 = vector.broadcast %284 : f32 to vector<8x128xf32>
    %286 = arith.mulf %187, %285 : vector<8x128xf32>
    %287 = arith.addf %283, %286 : vector<8x128xf32>
    %c9_143 = arith.constant 9 : index
    %c1_144 = arith.constant 1 : index
    %288 = memref.load %arg4[%c9_143, %c1_144] : memref<10x3xf32, #tpu.memory_space<smem>>
    %289 = vector.broadcast %288 : f32 to vector<8x128xf32>
    %290 = arith.mulf %207, %289 : vector<8x128xf32>
    %291 = arith.addf %287, %290 : vector<8x128xf32>
    %c1_145 = arith.constant 1 : index
    %292 = memref.load %arg5[%c1_145] : memref<3xf32, #tpu.memory_space<smem>>
    %293 = vector.broadcast %292 : f32 to vector<8x128xf32>
    %294 = arith.addf %291, %293 : vector<8x128xf32>
    %c1_146 = arith.constant 1 : index
    %c0_147 = arith.constant 0 : index
    %c0_148 = arith.constant 0 : index
    %295 = vector.load %arg6[%c1_146, %c0_147, %c0_148] : memref<3x8x128xf32, #tpu.memory_space<vmem>>, vector<1x8x128xf32>
    %296 = vector.shape_cast %295 : vector<1x8x128xf32> to vector<8x128xf32>
    %297 = vector.shape_cast %294 : vector<8x128xf32> to vector<1x8x128xf32>
    tpu.vector_store %arg6[%c1_146, %c0_147, %c0_148], %297 {strides = array<i32>} : memref<3x8x128xf32, #tpu.memory_space<vmem>>, vector<1x8x128xf32>,
    %c0_149 = arith.constant 0 : index
    %c2_150 = arith.constant 2 : index
    %298 = memref.load %arg4[%c0_149, %c2_150] : memref<10x3xf32, #tpu.memory_space<smem>>
    %299 = vector.broadcast %298 : f32 to vector<8x128xf32>
    %300 = arith.mulf %27, %299 : vector<8x128xf32>
    %c1_151 = arith.constant 1 : index
    %c2_152 = arith.constant 2 : index
    %301 = memref.load %arg4[%c1_151, %c2_152] : memref<10x3xf32, #tpu.memory_space<smem>>
    %302 = vector.broadcast %301 : f32 to vector<8x128xf32>
    %303 = arith.mulf %47, %302 : vector<8x128xf32>
    %304 = arith.addf %300, %303 : vector<8x128xf32>
    %c2_153 = arith.constant 2 : index
    %c2_154 = arith.constant 2 : index
    %305 = memref.load %arg4[%c2_153, %c2_154] : memref<10x3xf32, #tpu.memory_space<smem>>
    %306 = vector.broadcast %305 : f32 to vector<8x128xf32>
    %307 = arith.mulf %67, %306 : vector<8x128xf32>
    %308 = arith.addf %304, %307 : vector<8x128xf32>
    %c3_155 = arith.constant 3 : index
    %c2_156 = arith.constant 2 : index
    %309 = memref.load %arg4[%c3_155, %c2_156] : memref<10x3xf32, #tpu.memory_space<smem>>
    %310 = vector.broadcast %309 : f32 to vector<8x128xf32>
    %311 = arith.mulf %87, %310 : vector<8x128xf32>
    %312 = arith.addf %308, %311 : vector<8x128xf32>
    %c4_157 = arith.constant 4 : index
    %c2_158 = arith.constant 2 : index
    %313 = memref.load %arg4[%c4_157, %c2_158] : memref<10x3xf32, #tpu.memory_space<smem>>
    %314 = vector.broadcast %313 : f32 to vector<8x128xf32>
    %315 = arith.mulf %107, %314 : vector<8x128xf32>
    %316 = arith.addf %312, %315 : vector<8x128xf32>
    %c5_159 = arith.constant 5 : index
    %c2_160 = arith.constant 2 : index
    %317 = memref.load %arg4[%c5_159, %c2_160] : memref<10x3xf32, #tpu.memory_space<smem>>
    %318 = vector.broadcast %317 : f32 to vector<8x128xf32>
    %319 = arith.mulf %127, %318 : vector<8x128xf32>
    %320 = arith.addf %316, %319 : vector<8x128xf32>
    %c6_161 = arith.constant 6 : index
    %c2_162 = arith.constant 2 : index
    %321 = memref.load %arg4[%c6_161, %c2_162] : memref<10x3xf32, #tpu.memory_space<smem>>
    %322 = vector.broadcast %321 : f32 to vector<8x128xf32>
    %323 = arith.mulf %147, %322 : vector<8x128xf32>
    %324 = arith.addf %320, %323 : vector<8x128xf32>
    %c7_163 = arith.constant 7 : index
    %c2_164 = arith.constant 2 : index
    %325 = memref.load %arg4[%c7_163, %c2_164] : memref<10x3xf32, #tpu.memory_space<smem>>
    %326 = vector.broadcast %325 : f32 to vector<8x128xf32>
    %327 = arith.mulf %167, %326 : vector<8x128xf32>
    %328 = arith.addf %324, %327 : vector<8x128xf32>
    %c8_165 = arith.constant 8 : index
    %c2_166 = arith.constant 2 : index
    %329 = memref.load %arg4[%c8_165, %c2_166] : memref<10x3xf32, #tpu.memory_space<smem>>
    %330 = vector.broadcast %329 : f32 to vector<8x128xf32>
    %331 = arith.mulf %187, %330 : vector<8x128xf32>
    %332 = arith.addf %328, %331 : vector<8x128xf32>
    %c9_167 = arith.constant 9 : index
    %c2_168 = arith.constant 2 : index
    %333 = memref.load %arg4[%c9_167, %c2_168] : memref<10x3xf32, #tpu.memory_space<smem>>
    %334 = vector.broadcast %333 : f32 to vector<8x128xf32>
    %335 = arith.mulf %207, %334 : vector<8x128xf32>
    %336 = arith.addf %332, %335 : vector<8x128xf32>
    %c2_169 = arith.constant 2 : index
    %337 = memref.load %arg5[%c2_169] : memref<3xf32, #tpu.memory_space<smem>>
    %338 = vector.broadcast %337 : f32 to vector<8x128xf32>
    %339 = arith.addf %336, %338 : vector<8x128xf32>
    %c2_170 = arith.constant 2 : index
    %c0_171 = arith.constant 0 : index
    %c0_172 = arith.constant 0 : index
    %340 = vector.load %arg6[%c2_170, %c0_171, %c0_172] : memref<3x8x128xf32, #tpu.memory_space<vmem>>, vector<1x8x128xf32>
    %341 = vector.shape_cast %340 : vector<1x8x128xf32> to vector<8x128xf32>
    %342 = vector.shape_cast %339 : vector<8x128xf32> to vector<1x8x128xf32>
    tpu.vector_store %arg6[%c2_170, %c0_171, %c0_172], %342 {strides = array<i32>} : memref<3x8x128xf32, #tpu.memory_space<vmem>>, vector<1x8x128xf32>,
    return
  }
  func.func @transform_0(%arg0: i32) -> (i32, i32, i32) {
    %c0_i32 = arith.constant 0 : i32
    %c0_i32_0 = arith.constant 0 : i32
    %c0_i32_1 = arith.constant 0 : i32
    return %c0_i32, %arg0, %c0_i32_0 : i32, i32, i32
  }
  func.func @transform_1(%arg0: i32) -> (i32, i32) {
    %c0_i32 = arith.constant 0 : i32
    %c0_i32_0 = arith.constant 0 : i32
    %c0_i32_1 = arith.constant 0 : i32
    return %c0_i32, %c0_i32_0 : i32, i32
  }
  func.func @transform_2(%arg0: i32) -> i32 {
    %c0_i32 = arith.constant 0 : i32
    %c0_i32_0 = arith.constant 0 : i32
    return %c0_i32 : i32
  }
  func.func @transform_3(%arg0: i32) -> (i32, i32) {
    %c0_i32 = arith.constant 0 : i32
    %c0_i32_0 = arith.constant 0 : i32
    %c0_i32_1 = arith.constant 0 : i32
    return %c0_i32, %c0_i32_0 : i32, i32
  }
  func.func @transform_4(%arg0: i32) -> i32 {
    %c0_i32 = arith.constant 0 : i32
    %c0_i32_0 = arith.constant 0 : i32
    return %c0_i32 : i32
  }
  func.func @transform_5(%arg0: i32) -> (i32, i32, i32) {
    %c0_i32 = arith.constant 0 : i32
    %c0_i32_0 = arith.constant 0 : i32
    %c0_i32_1 = arith.constant 0 : i32
    return %c0_i32, %arg0, %c0_i32_0 : i32, i32, i32
  }
}

</mosaic_0001>

<bundles_post_ra>
// kernel: mlp_forward.1
= control target key start
LH: loop header
LB: loop body
LE: loop exit
PB: predicated region body
PF: predicated region fallthrough
CT: control target
= control target key end

     0   :  { %10 = vsyncpa [#allocation3], 0  ;;  %s917_s0 = inlined_call_operand.vmem [shape: f32[4,8,128], index: 0, kind: input, shape index: {}]   ;;  %s918_s1 = inlined_call_operand.vmem [shape: f32[4,10], index: 1, kind: input, shape index: {}]   ;;  %s919_s2 = inlined_call_operand.vmem [shape: f32[10], index: 2, kind: input, shape index: {}]   ;;  %s920_s3 = inlined_call_operand.vmem [shape: f32[10,3], index: 3, kind: input, shape index: {}]   ;;  %s921_s4 = inlined_call_operand.vmem [shape: f32[3], index: 4, kind: input, shape index: {}]   ;;  %s922_s5 = inlined_call_operand.vmem [shape: f32[3,8,128], index: 5, kind: output, shape index: {}]  }
   0x1   :  { %11 = vsyncpa [#allocation5], 0  ;;  %s29_s20 = sshll.u32 %s919_s2, 4  ;;  %s30_s20 = int_to_ptr.vmem [resolvable:$true] %s29_s20 }
   0x2   :  { %12 = vsyncpa [#allocation8], 0  ;;  %s20_s23 = sshll.u32 %s918_s1, 4  ;;  %s549_s24 = smov [#allocation4]   ;;  %s21_s23 = int_to_ptr.vmem [resolvable:$true] %s20_s23 }
   0x3   :  { %32 = dma.vmem_to_smem %s30_s20, 16, %s549_s24, [#allocation5]  }
   0x4   :  { %s550_s25 = smov [#allocation2]   ;;  %s37_s28 = sshll.u32 %s920_s3, 4  ;;  %s38_s28 = int_to_ptr.vmem [resolvable:$true] %s37_s28 }
   0x5   :  { %23 = dma.vmem_to_smem %s21_s23, 64, %s550_s25, [#allocation3]  }
   0x6   :  { %s49_s2 = sshll.u32 %s921_s4, 4  ;;  %s551_s6 = smov [#allocation6]   ;;  %s50_s2 = int_to_ptr.vmem [resolvable:$true] %s49_s2 }
   0x7   :  { %s552_s7 = smov 128   ;;  %s553_s8 = smov 8  }
   0x8   :  { %43 = dma.vmem_to_smem %s38_s28, 256, %s551_s6, [#allocation5], %s552_s7, %s552_s7, %s553_s8  }
   0x9   :  { %s554_s1 = smov [#allocation7]  }
   0xa   :  { %52 = dma.vmem_to_smem %s50_s2, 16, %s554_s1, [#allocation8]  }
   0xb   :  { %543 = dma.done.wait [#allocation3], 64  }
   0xc   :  { %544 = vsyncadd [#allocation3], 4294967232 }
   0xd   :  { %545 = dma.done.wait [#allocation5], 272  }
   0xe   :  { %546 = vsyncadd [#allocation5], 4294967024 }
   0xf   :  { %547 = dma.done.wait [#allocation8], 16  }
  0x10   :  { %548 = vsyncadd [#allocation8], 4294967280 }
  0x11   :  { %69 = sfence }
  0x12   :  { %s77_s3 = sld [smem:[#allocation2]]  ;;  %v628_v0 = vld [vmem:[%s917_s0] sm:$0xff]  ;;  %v633_v1 = vld [vmem:[%s917_s0 + $0x8] sm:$0xff]  ;;  %v648_v8 = vld [vmem:[%s917_s0 + $0x10] sm:$0xff] }
  0x13   :  { %s408_s9 = sld [smem:[#allocation2 + $0x80]]  ;;  %v668_v17 = vld [vmem:[%s917_s0 + $0x18] sm:$0xff] }
  0x14   :  { %s597_s10 = sld [smem:[#allocation2 + $0x100]] }
  0x15   :  { %s599_s11 = sld [smem:[#allocation2 + $0x180]] }
  0x16   :  { %s601_s4 = sld [smem:[#allocation4]] }
  0x17   :  { %s411_s12 = sld [smem:[#allocation2 + $0x1]] }
  0x18   :  { %s412_s13 = sld [smem:[#allocation2 + $0x81]]  ;;  %v78_v2 = vstv %s77_s3 }
  0x19   :  { %s603_s14 = sld [smem:[#allocation2 + $0x101]]  ;;  %v81_v3 = vstv %s408_s9  ;;  %v79_v6 = vmul.f32 %v78_v2, %v628_v0 }
  0x1a   :  { %s605_s15 = sld [smem:[#allocation2 + $0x181]]  ;;  %v82_v7 = vmul.f32 %v633_v1, %v81_v3  ;;  %v85_v9 = vstv %s597_s10 }
  0x1b   :  { %s607_s16 = sld [smem:[#allocation4 + $0x1]]  ;;  %v86_v16 = vmul.f32 %v648_v8, %v85_v9  ;;  %v89_v18 = vstv %s599_s11 }
  0x1c   :  { %s609_s17 = sld [smem:[#allocation2 + $0x2]]  ;;  %v83_v15 = vadd.f32 %v82_v7, %v79_v6  ;;  %v90_v26 = vmul.f32 %v668_v17, %v89_v18  ;;  %v93_v42 = vstv %s601_s4 }
  0x1d   :  { %s611_s18 = sld [smem:[#allocation2 + $0x82]]  ;;  %v97_v4 = vstv %s411_s12 }
  0x1e   :  { %s613_s19 = sld [smem:[#allocation2 + $0x102]]  ;;  %v100_v5 = vstv %s412_s13  ;;  %v98_v10 = vmul.f32 %v97_v4, %v628_v0  ;;  %v87_v25 = vadd.f32 %v86_v16, %v83_v15 }
  0x1f   :  { %s615_s20 = sld [smem:[#allocation2 + $0x182]]  ;;  %v101_v11 = vmul.f32 %v633_v1, %v100_v5  ;;  %v104_v12 = vstv %s603_s14 }
  0x20   :  { %s617_s21 = sld [smem:[#allocation4 + $0x2]]  ;;  %v105_v20 = vmul.f32 %v648_v8, %v104_v12  ;;  %v108_v21 = vstv %s605_s15  ;;  %v91_v38 = vadd.f32 %v90_v26, %v87_v25 }
  0x21   :  { %s619_s22 = sld [smem:[#allocation2 + $0x3]]  ;;  %v102_v19 = vadd.f32 %v101_v11, %v98_v10  ;;  %v109_v30 = vmul.f32 %v668_v17, %v108_v21  ;;  %v112_v43 = vstv %s607_s16 }
  0x22   :  { %s621_s23 = sld [smem:[#allocation2 + $0x83]]  ;;  %v116_v13 = vstv %s609_s17  ;;  %v94_v54 = vadd.f32 %v93_v42, %v91_v38 }
  0x23   :  { %s623_s24 = sld [smem:[#allocation2 + $0x103]]  ;;  %v119_v14 = vstv %s611_s18  ;;  %v117_v22 = vmul.f32 %v116_v13, %v628_v0  ;;  %v106_v29 = vadd.f32 %v105_v20, %v102_v19 }
  0x24   :  { %s635_s29 = sld [smem:[#allocation2 + $0x183]]  ;;  %v120_v23 = vmul.f32 %v633_v1, %v119_v14  ;;  %v123_v24 = vstv %s613_s19  ;;  %v748_v16 = vmax.f32 %v94_v54, 0.0 }
  0x25   :  { %s637_s30 = sld [smem:[#allocation4 + $0x3]]  ;;  %v124_v32 = vmul.f32 %v648_v8, %v123_v24  ;;  %v127_v35 = vstv %s615_s20  ;;  %v110_v46 = vadd.f32 %v109_v30, %v106_v29 }
  0x26   :  { %s639_s2 = sld [smem:[#allocation2 + $0x4]]  ;;  %v121_v31 = vadd.f32 %v120_v23, %v117_v22  ;;  %v128_v48 = vmul.f32 %v668_v17, %v127_v35  ;;  %v131_v63 = vstv %s617_s21 }
  0x27   :  { %s643_s6 = sld [smem:[#allocation2 + $0x84]]  ;;  %v135_v27 = vstv %s619_s22  ;;  %v113_v61 = vadd.f32 %v112_v43, %v110_v46 }
  0x28   :  { %s653_s1 = sld [smem:[#allocation2 + $0x104]]  ;;  %v138_v28 = vstv %s621_s23  ;;  %v136_v36 = vmul.f32 %v135_v27, %v628_v0  ;;  %v125_v47 = vadd.f32 %v124_v32, %v121_v31 }
  0x29   :  { %s656_s3 = sld [smem:[#allocation2 + $0x184]]  ;;  %v139_v37 = vmul.f32 %v633_v1, %v138_v28  ;;  %v142_v39 = vstv %s623_s24  ;;  %v754_v20 = vmax.f32 %v113_v61, 0.0 }
  0x2a   :  { %s660_s9 = sld [smem:[#allocation4 + $0x4]]  ;;  %v143_v51 = vmul.f32 %v648_v8, %v142_v39  ;;  %v146_v55 = vstv %s635_s29  ;;  %v129_v62 = vadd.f32 %v128_v48, %v125_v47 }
  0x2b   :  { %s663_s10 = sld [smem:[#allocation2 + $0x5]]  ;;  %v140_v50 = vadd.f32 %v139_v37, %v136_v36  ;;  %v147_v4 = vmul.f32 %v668_v17, %v146_v55  ;;  %v150_v25 = vstv %s637_s30 }
  0x2c   :  { %s672_s14 = sld [smem:[#allocation2 + $0x85]]  ;;  %v154_v33 = vstv %s639_s2  ;;  %v132_v24 = vadd.f32 %v131_v63, %v129_v62 }
  0x2d   :  { %s677_s17 = sld [smem:[#allocation2 + $0x105]]  ;;  %v157_v34 = vstv %s643_s6  ;;  %v155_v44 = vmul.f32 %v154_v33, %v628_v0  ;;  %v144_v3 = vadd.f32 %v143_v51, %v140_v50 }
  0x2e   :  { %s680_s18 = sld [smem:[#allocation2 + $0x185]]  ;;  %v158_v45 = vmul.f32 %v633_v1, %v157_v34  ;;  %v161_v49 = vstv %s653_s1 }
  0x2f   :  { %s685_s0 = sld [smem:[#allocation4 + $0x5]]  ;;  %v162_v58 = vmul.f32 %v648_v8, %v161_v49  ;;  %v165_v2 = vstv %s656_s3  ;;  %v148_v28 = vadd.f32 %v147_v4, %v144_v3 }
  0x30   :  { %s688_s11 = sld [smem:[#allocation2 + $0x6]]  ;;  %v159_v57 = vadd.f32 %v158_v45, %v155_v44  ;;  %v166_v13 = vmul.f32 %v668_v17, %v165_v2  ;;  %v783_v44 = vmax.f32 %v132_v24, 0.0 }
  0x31   :  { %s693_s15 = sld [smem:[#allocation2 + $0x86]]  ;;  %v173_v40 = vstv %s663_s10  ;;  %v151_v45 = vadd.f32 %v150_v25, %v148_v28 }
  0x32   :  { %s698_s19 = sld [smem:[#allocation2 + $0x106]]  ;;  %v176_v41 = vstv %s672_s14  ;;  %v174_v52 = vmul.f32 %v173_v40, %v628_v0  ;;  %v163_v12 = vadd.f32 %v162_v58, %v159_v57  ;;  %v169_v40 = vstv %s660_s9 }
  0x33   :  { %s703_s22 = sld [smem:[#allocation2 + $0x186]]  ;;  %v177_v53 = vmul.f32 %v633_v1, %v176_v41  ;;  %v180_v56 = vstv %s677_s17 }
  0x34   :  { %s709_s20 = sld [smem:[#allocation4 + $0x6]]  ;;  %v181_v6 = vmul.f32 %v648_v8, %v180_v56  ;;  %v184_v7 = vstv %s680_s18  ;;  %v167_v29 = vadd.f32 %v166_v13, %v163_v12 }
  0x35   :  { %s713_s23 = sld [smem:[#allocation2 + $0x7]]  ;;  %v178_v5 = vadd.f32 %v177_v53, %v174_v52  ;;  %v185_v22 = vmul.f32 %v668_v17, %v184_v7  ;;  %v188_v41 = vstv %s685_s0 }
  0x36   :  { %s718_s4 = sld [smem:[#allocation2 + $0x87]]  ;;  %v192_v59 = vstv %s688_s11  ;;  %v170_v52 = vadd.f32 %v169_v40, %v167_v29 }
  0x37   :  { %s722_s16 = sld [smem:[#allocation2 + $0x107]]  ;;  %v195_v60 = vstv %s693_s15  ;;  %v193_v9 = vmul.f32 %v192_v59, %v628_v0  ;;  %v182_v21 = vadd.f32 %v181_v6, %v178_v5 }
  0x38   :  { %s727_s24 = sld [smem:[#allocation2 + $0x187]]  ;;  %v196_v10 = vmul.f32 %v633_v1, %v195_v60  ;;  %v199_v14 = vstv %s698_s19  ;;  %v812_v4 = vmax.f32 %v170_v52, 0.0 }
  0x39   :  { %s731_s25 = sld [smem:[#allocation4 + $0x7]]  ;;  %v200_v27 = vmul.f32 %v648_v8, %v199_v14  ;;  %v203_v30 = vstv %s703_s22  ;;  %v186_v36 = vadd.f32 %v185_v22, %v182_v21 }
  0x3a   :  { %s735_s26 = sld [smem:[#allocation2 + $0x8]]  ;;  %v197_v26 = vadd.f32 %v196_v10, %v193_v9  ;;  %v204_v43 = vmul.f32 %v668_v17, %v203_v30  ;;  %v207_v57 = vstv %s709_s20 }
  0x3b   :  { %v211_v11 = vstv %s713_s23  ;;  %s741_s21 = sld [smem:[#allocation2 + $0x88]]  ;;  %v189_v53 = vadd.f32 %v188_v41, %v186_v36 }
  0x3c   :  { %v214_v15 = vstv %s718_s4  ;;  %s746_s27 = sld [smem:[#allocation2 + $0x108]]  ;;  %v212_v18 = vmul.f32 %v211_v11, %v628_v0  ;;  %v201_v42 = vadd.f32 %v200_v27, %v197_v26 }
  0x3d   :  { %v215_v19 = vmul.f32 %v633_v1, %v214_v15  ;;  %s752_s28 = sld [smem:[#allocation2 + $0x188]]  ;;  %v218_v23 = vstv %s722_s16  ;;  %v814_v5 = vmax.f32 %v189_v53, 0.0 }
  0x3e   :  { %s758_s29 = sld [smem:[#allocation4 + $0x8]]  ;;  %v219_v33 = vmul.f32 %v648_v8, %v218_v23  ;;  %v222_v37 = vstv %s727_s24  ;;  %v205_v56 = vadd.f32 %v204_v43, %v201_v42 }
  0x3f   :  { %s762_s2 = sld [smem:[#allocation2 + $0x9]]  ;;  %v216_v32 = vadd.f32 %v215_v19, %v212_v18  ;;  %v223_v49 = vmul.f32 %v668_v17, %v222_v37  ;;  %v226_v6 = vstv %s731_s25 }
  0x40   :  { %v230_v31 = vstv %s735_s26  ;;  %s766_s6 = sld [smem:[#allocation2 + $0x89]]  ;;  %v208_v7 = vadd.f32 %v207_v57, %v205_v56 }
  0x41   :  { %v231_v34 = vmul.f32 %v230_v31, %v628_v0  ;;  %v233_v35 = vstv %s741_s21  ;;  %s771_s30 = sld [smem:[#allocation2 + $0x109]]  ;;  %v220_v48 = vadd.f32 %v219_v33, %v216_v32 }
  0x42   :  { %v234_v38 = vmul.f32 %v633_v1, %v233_v35  ;;  %v237_v39 = vstv %s746_s27  ;;  %s776_s7 = sld [smem:[#allocation2 + $0x189]]  ;;  %v839_v27 = vmax.f32 %v208_v7, 0.0 }
  0x43   :  { %s781_s8 = sld [smem:[#allocation4 + $0x9]]  ;;  %v238_v47 = vmul.f32 %v648_v8, %v237_v39  ;;  %v241_v50 = vstv %s752_s28  ;;  %v224_v2 = vadd.f32 %v223_v49, %v220_v48 }
  0x44   :  { %v235_v46 = vadd.f32 %v234_v38, %v231_v34  ;;  %s786_s1 = sld [smem:[#allocation6]]  ;;  %v242_v61 = vmul.f32 %v668_v17, %v241_v50  ;;  %v245_v12 = vstv %s758_s29 }
  0x45   :  { %v249_v51 = vstv %s762_s2  ;;  %s791_s3 = sld [smem:[#allocation6 + $0x80]]  ;;  %v227_v15 = vadd.f32 %v226_v6, %v224_v2 }
  0x46   :  { %v250_v54 = vmul.f32 %v249_v51, %v628_v0  ;;  %v252_v55 = vstv %s766_s6  ;;  %s795_s9 = sld [smem:[#allocation6 + $0x100]]  ;;  %v239_v60 = vadd.f32 %v238_v47, %v235_v46  ;;  %v807_v0 = vmax.f32 %v151_v45, 0.0 }
  0x47   :  { %v253_v58 = vmul.f32 %v633_v1, %v252_v55  ;;  %v256_v59 = vstv %s771_s30  ;;  %s800_s10 = sld [smem:[#allocation6 + $0x180]]  ;;  %v843_v33 = vmax.f32 %v227_v15, 0.0 }
  0x48   :  { %v257_v62 = vmul.f32 %v648_v8, %v256_v59  ;;  %v260_v63 = vstv %s776_s7  ;;  %s805_s12 = sld [smem:[#allocation6 + $0x200]] }
  0x49   :  { %v254_v3 = vadd.f32 %v253_v58, %v250_v54  ;;  %v261_v1 = vmul.f32 %v668_v17, %v260_v63  ;;  %s810_s13 = sld [smem:[#allocation6 + $0x280]]  ;;  %v243_v17 = vadd.f32 %v242_v61, %v239_v60  ;;  %v264_v22 = vstv %s781_s8 }
  0x4a   :  { %v268_v8 = vstv %s786_s1  ;;  %s818_s14 = sld [smem:[#allocation6 + $0x300]] }
  0x4b   :  { %v258_v9 = vadd.f32 %v257_v62, %v254_v3  ;;  %v269_v10 = vmul.f32 %v268_v8, %v748_v16  ;;  %v271_v11 = vstv %s791_s3  ;;  %s822_s17 = sld [smem:[#allocation6 + $0x380]]  ;;  %v246_v28 = vadd.f32 %v245_v12, %v243_v17 }
  0x4c   :  { %v272_v13 = vmul.f32 %v271_v11, %v754_v20  ;;  %v275_v14 = vstv %s795_s9  ;;  %s827_s18 = sld [smem:[#allocation6 + $0x400]] }
  0x4d   :  { %v262_v18 = vadd.f32 %v261_v1, %v258_v9  ;;  %v276_v19 = vmul.f32 %v275_v14, %v783_v44  ;;  %v279_v21 = vstv %s800_s10  ;;  %s831_s0 = sld [smem:[#allocation6 + $0x480]]  ;;  %v849_v37 = vmax.f32 %v246_v28, 0.0 }
  0x4e   :  { %v273_v23 = vadd.f32 %v272_v13, %v269_v10  ;;  %v280_v24 = vmul.f32 %v279_v21, %v807_v0  ;;  %v283_v25 = vstv %s805_s12  ;;  %s836_s11 = sld [smem:[#allocation7]] }
  0x4f   :  { %v287_v26 = vstv %s810_s13  ;;  %s465_s15 = sld [smem:[#allocation6 + $0x1]]  ;;  %v284_v30 = vmul.f32 %v283_v25, %v812_v4  ;;  %v265_v31 = vadd.f32 %v264_v22, %v262_v18 }
  0x50   :  { %v277_v29 = vadd.f32 %v276_v19, %v273_v23  ;;  %s466_s19 = sld [smem:[#allocation6 + $0x81]]  ;;  %v291_v32 = vstv %s818_s14  ;;  %v288_v35 = vmul.f32 %v287_v26, %v814_v5 }
  0x51   :  { %s467_s22 = sld [smem:[#allocation6 + $0x101]]  ;;  %v295_v36 = vstv %s822_s17  ;;  %v292_v39 = vmul.f32 %v291_v32, %v839_v27  ;;  %v854_v40 = vmax.f32 %v265_v31, 0.0 }
  0x52   :  { %v281_v34 = vadd.f32 %v280_v24, %v277_v29  ;;  %s468_s20 = sld [smem:[#allocation6 + $0x181]]  ;;  %v299_v41 = vstv %s827_s18  ;;  %v296_v45 = vmul.f32 %v295_v36, %v843_v33 }
  0x53   :  { %s847_s23 = sld [smem:[#allocation6 + $0x201]]  ;;  %v303_v48 = vstv %s831_s0  ;;  %v300_v52 = vmul.f32 %v299_v41, %v849_v37 }
  0x54   :  { %v285_v38 = vadd.f32 %v284_v30, %v281_v34  ;;  %s852_s4 = sld [smem:[#allocation6 + $0x281]]  ;;  %v304_v59 = vmul.f32 %v303_v48, %v854_v40  ;;  %v307_v3 = vstv %s836_s11 }
  0x55   :  { %v311_v42 = vstv %s465_s15  ;;  %s857_s16 = sld [smem:[#allocation6 + $0x301]] }
  0x56   :  { %v289_v43 = vadd.f32 %v288_v35, %v285_v38  ;;  %v312_v46 = vmul.f32 %v311_v42, %v748_v16  ;;  %v314_v47 = vstv %s466_s19  ;;  %s861_s24 = sld [smem:[#allocation6 + $0x381]] }
  0x57   :  { %v315_v49 = vmul.f32 %v314_v47, %v754_v20  ;;  %v318_v50 = vstv %s467_s22  ;;  %s865_s25 = sld [smem:[#allocation6 + $0x401]] }
  0x58   :  { %v293_v51 = vadd.f32 %v292_v39, %v289_v43  ;;  %v319_v53 = vmul.f32 %v318_v50, %v783_v44  ;;  %v322_v54 = vstv %s468_s20  ;;  %s869_s26 = sld [smem:[#allocation6 + $0x481]] }
  0x59   :  { %v316_v55 = vadd.f32 %v315_v49, %v312_v46  ;;  %v323_v56 = vmul.f32 %v322_v54, %v807_v0  ;;  %v326_v57 = vstv %s847_s23  ;;  %s873_s21 = sld [smem:[#allocation7 + $0x1]] }
  0x5a   :  { %v297_v58 = vadd.f32 %v296_v45, %v293_v51  ;;  %v330_v60 = vstv %s852_s4  ;;  %s477_s27 = sld [smem:[#allocation6 + $0x2]]  ;;  %v327_v62 = vmul.f32 %v326_v57, %v812_v4 }
  0x5b   :  { %v320_v61 = vadd.f32 %v319_v53, %v316_v55  ;;  %s478_s28 = sld [smem:[#allocation6 + $0x82]]  ;;  %v334_v2 = vstv %s857_s16  ;;  %v331_v6 = vmul.f32 %v330_v60, %v814_v5 }
  0x5c   :  { %v301_v63 = vadd.f32 %v300_v52, %v297_v58  ;;  %s479_s29 = sld [smem:[#allocation6 + $0x102]]  ;;  %v338_v7 = vstv %s861_s24  ;;  %v335_v10 = vmul.f32 %v334_v2, %v839_v27 }
  0x5d   :  { %v324_v1 = vadd.f32 %v323_v56, %v320_v61  ;;  %s480_s2 = sld [smem:[#allocation6 + $0x182]]  ;;  %v342_v17 = vstv %s865_s25  ;;  %v339_v14 = vmul.f32 %v338_v7, %v843_v33 }
  0x5e   :  { %v305_v8 = vadd.f32 %v304_v59, %v301_v63  ;;  %s481_s6 = sld [smem:[#allocation6 + $0x202]]  ;;  %v346_v19 = vstv %s869_s26  ;;  %v343_v24 = vmul.f32 %v342_v17, %v849_v37 }
  0x5f   :  { %v328_v9 = vadd.f32 %v327_v62, %v324_v1  ;;  %s883_s30 = sld [smem:[#allocation6 + $0x282]]  ;;  %v347_v31 = vmul.f32 %v346_v19, %v854_v40  ;;  %v350_v38 = vstv %s873_s21 }
  0x60   :  { %v308_v11 = vadd.f32 %v307_v3, %v305_v8  ;;  %v355_v12 = vstv %s477_s27  ;;  %s886_s7 = sld [smem:[#allocation6 + $0x302]] }
  0x61   :  { %v332_v13 = vadd.f32 %v331_v6, %v328_v9  ;;  %v356_v15 = vmul.f32 %v355_v12, %v748_v16  ;;  %v358_v18 = vstv %s478_s28  ;;  %s890_s8 = sld [smem:[#allocation6 + $0x382]] }
  0x62   :  { %309 = vst [vmem:[%s922_s5] sm:$0xff] %v308_v11  ;;  %v359_v21 = vmul.f32 %v358_v18, %v754_v20  ;;  %v362_v22 = vstv %s479_s29  ;;  %s485_s9 = sld [smem:[#allocation6 + $0x402]] }
  0x63   :  { %v336_v23 = vadd.f32 %v335_v10, %v332_v13  ;;  %v363_v25 = vmul.f32 %v362_v22, %v783_v44  ;;  %v366_v16 = vstv %s480_s2  ;;  %s486_s10 = sld [smem:[#allocation6 + $0x482]] }
  0x64   :  { %v360_v26 = vadd.f32 %v359_v21, %v356_v15  ;;  %v367_v28 = vmul.f32 %v366_v16, %v807_v0  ;;  %v370_v29 = vstv %s481_s6  ;;  %s487_s12 = sld [smem:[#allocation7 + $0x2]] }
  0x65   :  { %v340_v30 = vadd.f32 %v339_v14, %v336_v23  ;;  %v374_v32 = vstv %s883_s30  ;;  %v371_v34 = vmul.f32 %v370_v29, %v812_v4 }
  0x66   :  { %v364_v20 = vadd.f32 %v363_v25, %v360_v26  ;;  %v378_v36 = vstv %s886_s7  ;;  %v375_v44 = vmul.f32 %v374_v32, %v814_v5 }
  0x67   :  { %v344_v35 = vadd.f32 %v343_v24, %v340_v30  ;;  %v382_v42 = vstv %s890_s8  ;;  %v379_v0 = vmul.f32 %v378_v36, %v839_v27 }
  0x68   :  { %v368_v39 = vadd.f32 %v367_v28, %v364_v20  ;;  %v386_v46 = vstv %s485_s9  ;;  %v383_v48 = vmul.f32 %v382_v42, %v843_v33 }
  0x69   :  { %v348_v41 = vadd.f32 %v347_v31, %v344_v35  ;;  %v390_v4 = vstv %s486_s10  ;;  %v387_v50 = vmul.f32 %v386_v46, %v849_v37 }
  0x6a   :  { %v372_v43 = vadd.f32 %v371_v34, %v368_v39  ;;  %v391_v51 = vmul.f32 %v390_v4, %v854_v40  ;;  %v394_v53 = vstv %s487_s12 }
  0x6b   :  { %v351_v45 = vadd.f32 %v350_v38, %v348_v41 }
  0x6c   :  { %v376_v47 = vadd.f32 %v375_v44, %v372_v43 }
  0x6d   :  { %476 = vst [vmem:[%s922_s5 + $0x8] sm:$0xff] %v351_v45 }
  0x6e   :  { %v380_v49 = vadd.f32 %v379_v0, %v376_v47 }
  0x70   :  { %v384_v5 = vadd.f32 %v383_v48, %v380_v49 }
  0x72   :  { %v388_v52 = vadd.f32 %v387_v50, %v384_v5 }
  0x74   :  { %v392_v27 = vadd.f32 %v391_v51, %v388_v52 }
  0x76   :  { %v395_v54 = vadd.f32 %v394_v53, %v392_v27 }
  0x78   :  { %488 = vst [vmem:[%s922_s5 + $0x10] sm:$0xff] %v395_v54 }
  0x79   :  { %402 = vsyncpa [#allocation3], 1 }
  0x7a   :  { %403 = vsyncpa [#allocation5], 1 }
  0x7b   :  { %404 = vsyncpa [#allocation8], 1 }

</bundles_post_ra>
